<compile_context>
chip_gen: v5e
topology: v5e:2x2
jax: 0.10.0
libtpu: 0.0.40
codegen_flags: <defaults>
</compile_context>

<pallas_src>
import functools

import jax
import jax.numpy as jnp
from jax.experimental import pallas as pl
from jax.experimental.pallas import tpu as pltpu


_VMEM_BUDGET = 20 * 1024 * 1024          # double-buffered working-set target
_VMEM_LIMIT = 32 * 1024 * 1024           # <= scoped default on v6e/v7x, raises v5e
_MAX_FOLDED_WEIGHT_BYTES = 8 * 1024 * 1024
_DIVISORS_128 = (1, 2, 4, 8, 16, 32, 64, 128)


def _linear_kernel(x_ref, w_ref, b_ref, o_ref):
    # Hot path: one MXU matmul (f32 accumulate) + bias add, all operands in VMEM.
    acc = jnp.dot(x_ref[...], w_ref[...], preferred_element_type=jnp.float32)
    o_ref[...] = (acc + b_ref[...]).astype(o_ref.dtype)


def _cdiv(a, b):
    return -(-a // b)


def _round_up(x, m):
    return ((x + m - 1) // m) * m


def _fold_factor(num_class):
    """Fold factor F and padded class count Cp so that F * Cp == 128 (lane-dense)."""
    if num_class >= 128:
        return 1, num_class
    for d in _DIVISORS_128:
        if d >= num_class:
            return 128 // d, d
    return 1, num_class  # unreachable


@functools.partial(jax.jit, static_argnames=("tm",))
def logistic_regression_forward(x, weight, bias, *, tm=32768):
    """GraphMAE2 LogisticRegression.forward(g, x): logits = x @ weight.T + bias.

    x:      (N, D) features (float32 for strict parity; bfloat16 accepted as-is)
    weight: (C, D) nn.Linear weight
    bias:   (C,)   nn.Linear bias
    Returns (N, C) float32 logits.
    """
    N, D = x.shape
    C = weight.shape[0]

    cdt = x.dtype                          # compute dtype follows the feature dtype
    x_item = jnp.dtype(cdt).itemsize

    # ---- Fold factor (lane-dense stores), D-aware so the block-diag weight stays small.
    F, Cp = _fold_factor(C)
    while F > 1 and (F * D) * (F * Cp) * x_item > _MAX_FOLDED_WEIGHT_BYTES:
        F //= 2

    n_main = (N // F) * F                  # rows handled by the kernel
    rows = n_main // F                     # folded rows

    def tail_logits():
        # < F rows: negligible; computed in plain JAX (f32) and concatenated.
        xt = x[n_main:].astype(jnp.float32)
        return xt @ weight.T.astype(jnp.float32) + bias.astype(jnp.float32)

    if rows == 0:                          # tiny batch: everything is "tail"
        return tail_logits()

    # ---- Fold the input.  Free bitcast when n_main == N; for ragged N the prefix
    # slice costs one extra pass over x (still never worse than the old pad copy,
    # and the common fold-aligned case is now copy-free).
    x_main = x if n_main == N else x[:n_main]
    x_f = x_main.reshape(rows, F * D)

    # ---- Block-diagonal weight / tiled bias (tiny, resident in VMEM).
    w_t = weight.T.astype(cdt)                                  # (D, C)
    if Cp != C:
        w_t = jnp.pad(w_t, ((0, 0), (0, Cp - C)))               # (D, Cp)
    w_big = jnp.kron(jnp.eye(F, dtype=cdt), w_t)                # (F*D, F*Cp)
    b_p = bias.astype(jnp.float32)
    if Cp != C:
        b_p = jnp.pad(b_p, ((0, Cp - C),))
    b_big = jnp.tile(b_p, F).reshape(1, F * Cp)

    cols_in, cols_out = F * D, F * Cp
    w_bytes = cols_in * cols_out * x_item + cols_out * 4

    # ---- Row-tile selection (folded rows).
    unit = 8 if x_item >= 4 else 16        # sublane granule (16 for packed dtypes)
    per_row = 2 * (cols_in * x_item + cols_out * 4)   # 2x-buffered x tile + f32 out tile
    avail = max(_VMEM_BUDGET - w_bytes, per_row * unit)
    tr_vmem = max(unit, (avail // per_row) // unit * unit)

    tr = max(unit, (tm // F) // unit * unit)           # requested tile (folded rows)
    tr = min(tr, tr_vmem)
    if rows > unit:
        # Keep at least 2 grid steps so ("parallel",) can shard across v7x's 2 TCs.
        tr = min(tr, _round_up(_cdiv(rows, 2), unit))
        tr = min(tr, _round_up(rows, unit))
    else:
        tr = rows                                       # single block == full array dim
    grid = _cdiv(rows, tr)

    cost = pl.CostEstimate(
        flops=2 * rows * cols_in * cols_out,
        transcendentals=0,
        bytes_accessed=rows * cols_in * x_item + w_bytes + rows * cols_out * 4,
    )

    out_f = pl.pallas_call(
        _linear_kernel,
        out_shape=jax.ShapeDtypeStruct((rows, cols_out), jnp.float32),
        grid_spec=pltpu.PrefetchScalarGridSpec(
            num_scalar_prefetch=0,
            grid=(grid,),
            in_specs=[
                pl.BlockSpec((tr, cols_in), lambda i: (i, 0)),        # lane-dense x tile
                pl.BlockSpec((cols_in, cols_out), lambda i: (0, 0)),  # resident weight
                pl.BlockSpec((1, cols_out), lambda i: (0, 0)),        # resident bias
            ],
            out_specs=pl.BlockSpec((tr, cols_out), lambda i: (i, 0)),  # lane-dense out
        ),
        compiler_params=pltpu.CompilerParams(
            dimension_semantics=("parallel",),
            vmem_limit_bytes=_VMEM_LIMIT,
        ),
        cost_estimate=cost,
    )(x_f, w_big, b_big)

    # Unfold (free row-major relabel), drop padded logit columns, append the tail.
    out_main = out_f.reshape(n_main, Cp)
    if Cp != C:
        out_main = out_main[:, :C]
    if n_main == N:
        return out_main
    return jnp.concatenate([out_main, tail_logits()], axis=0)


if __name__ == "__main__":
    key = jax.random.PRNGKey(0)

    def init_linear(kw, kb, num_class, num_dim):
        # Mimics nn.Linear's uniform(-1/sqrt(D), 1/sqrt(D)) init, deterministically.
        bound = 1.0 / jnp.sqrt(jnp.float32(num_dim))
        w = jax.random.uniform(kw, (num_class, num_dim), jnp.float32, -bound, bound)
        b = jax.random.uniform(kb, (num_class,), jnp.float32, -bound, bound)
        return w, b

    # Case 1: ragged N (exercises ragged grid + jnp.dot tail), C divides 128.
    N, num_dim, num_class = 300, 32, 8
    kw, kb, kx, key = jax.random.split(key, 4)
    weight, bias = init_linear(kw, kb, num_class, num_dim)
    x = jax.random.normal(kx, (N, num_dim), jnp.float32)
    ref = x @ weight.T + bias

    logits = logistic_regression_forward(x, weight, bias)
    jax.block_until_ready(logits)
    assert logits.shape == (N, num_class)
    assert jnp.allclose(logits, ref, atol=1e-5, rtol=1e-5)

    # Case 2: fold-aligned N (copy-free bitcast path), C not a divisor of 128
    # (exercises the padded-class lane-dense store path).
    N2, D2, C2 = 256, 32, 5
    kw2, kb2, kx2, key = jax.random.split(key, 4)
    w2, b2 = init_linear(kw2, kb2, C2, D2)
    x2 = jax.random.normal(kx2, (N2, D2), jnp.float32)
    ref2 = x2 @ w2.T + b2
    logits2 = logistic_regression_forward(x2, w2, b2)
    jax.block_until_ready(logits2)
    assert logits2.shape == (N2, C2)
    assert jnp.allclose(logits2, ref2, atol=1e-5, rtol=1e-5)

    # Case 3: features already stored in bf16 (bandwidth path, no wrapper cast),
    # f32 accumulation, loose tolerance (documented: not strict nn.Linear parity).
    logits_bf16 = logistic_regression_forward(x.astype(jnp.bfloat16), weight, bias)
    jax.block_until_ready(logits_bf16)
    assert jnp.allclose(logits_bf16, ref, atol=5e-2, rtol=5e-2)

    print("KERNEL_OK")
</pallas_src>

<mosaic_0001>
module attributes {stable_mosaic.version = 11 : i64} {
  func.func @_linear_kernel(%arg0: i32, %arg1: memref<16x512xf32, #tpu.memory_space<vmem>>, %arg2: memref<512x128xf32, #tpu.memory_space<vmem>>, %arg3: memref<1x128xf32, #tpu.memory_space<vmem>>, %arg4: memref<16x128xf32, #tpu.memory_space<vmem>>) attributes {dimension_semantics = [#tpu.dimension_semantics<parallel>], iteration_bounds = array<i64: 2>, scalar_prefetch = 0 : i64, scratch_operands = 0 : i64, tpu.core_type = #tpu.core_type<tc>, window_params = [{transform_indices = @transform_0, window_bounds = array<i64: 16, 512>}, {pipeline_mode = #tpu.pipeline_mode<synchronous>, transform_indices = @transform_1, window_bounds = array<i64: 512, 128>}, {pipeline_mode = #tpu.pipeline_mode<synchronous>, transform_indices = @transform_2, window_bounds = array<i64: 1, 128>}, {transform_indices = @transform_3, window_bounds = array<i64: 16, 128>}]} {
    %c0 = arith.constant 0 : index
    %c0_0 = arith.constant 0 : index
    %0 = vector.load %arg1[%c0, %c0_0] : memref<16x512xf32, #tpu.memory_space<vmem>>, vector<16x512xf32>
    %c0_1 = arith.constant 0 : index
    %c0_2 = arith.constant 0 : index
    %1 = vector.load %arg2[%c0_1, %c0_2] : memref<512x128xf32, #tpu.memory_space<vmem>>, vector<512x128xf32>
    %cst = arith.constant dense<0.000000e+00> : vector<16x128xf32>
    %2 = tpu.matmul %0, %1, %cst {dimension_numbers = #tpu.dot_dimension_numbers<[1], [0], [0], [1], [0, 0, 1, 1], [], []>} : vector<16x512xf32>, vector<512x128xf32>, vector<16x128xf32> -> vector<16x128xf32>
    %c0_3 = arith.constant 0 : index
    %c0_4 = arith.constant 0 : index
    %3 = vector.load %arg3[%c0_3, %c0_4] : memref<1x128xf32, #tpu.memory_space<vmem>>, vector<1x128xf32>
    %4 = vector.broadcast %3 : vector<1x128xf32> to vector<16x128xf32>
    %5 = arith.addf %2, %4 : vector<16x128xf32>
    %c0_5 = arith.constant 0 : index
    %c0_6 = arith.constant 0 : index
    %6 = vector.load %arg4[%c0_5, %c0_6] : memref<16x128xf32, #tpu.memory_space<vmem>>, vector<16x128xf32>
    tpu.vector_store %arg4[%c0_5, %c0_6], %5 {strides = array<i32>} : memref<16x128xf32, #tpu.memory_space<vmem>>, vector<16x128xf32>,
    return
  }
  func.func @transform_0(%arg0: i32) -> (i32, i32) {
    %c0_i32 = arith.constant 0 : i32
    %c0_i32_0 = arith.constant 0 : i32
    return %arg0, %c0_i32 : i32, i32
  }
  func.func @transform_1(%arg0: i32) -> (i32, i32) {
    %c0_i32 = arith.constant 0 : i32
    %c0_i32_0 = arith.constant 0 : i32
    %c0_i32_1 = arith.constant 0 : i32
    return %c0_i32, %c0_i32_0 : i32, i32
  }
  func.func @transform_2(%arg0: i32) -> (i32, i32) {
    %c0_i32 = arith.constant 0 : i32
    %c0_i32_0 = arith.constant 0 : i32
    %c0_i32_1 = arith.constant 0 : i32
    return %c0_i32, %c0_i32_0 : i32, i32
  }
  func.func @transform_3(%arg0: i32) -> (i32, i32) {
    %c0_i32 = arith.constant 0 : i32
    %c0_i32_0 = arith.constant 0 : i32
    return %arg0, %c0_i32 : i32, i32
  }
}

</mosaic_0001>

<bundles_post_ra>
// kernel: tile.8
= control target key start
LH: loop header
LB: loop body
LE: loop exit
PB: predicated region body
PF: predicated region fallthrough
CT: control target
= control target key end

     0   :  { %s28_s0 = inlined_call_operand.vmem [shape: f32[8], index: 0, kind: input, shape index: {}]   ;;  %s29_s1 = inlined_call_operand.vmem [shape: f32[16,8], index: 1, kind: output, shape index: {}]  }
   0x1   :  { %v4_v0 = vld [vmem:[%s28_s0] ss:$0 sm:$0xff] }
   0x2   :  { %5 = vst [vmem:[%s29_s1] sm:$0xff] %v4_v0 }
   0x3   :  { %8 = vst [vmem:[%s29_s1 + $0x8] sm:$0xff] %v4_v0 }

// kernel: tile.9
= control target key start
LH: loop header
LB: loop body
LE: loop exit
PB: predicated region body
PF: predicated region fallthrough
CT: control target
= control target key end

     0   :  { %s131_s10 = smov 120   ;;  %s132_s11 = smov 104   ;;  %vm3_vm0 = vcmask 64512   ;;  %vm9_vm1 = vcmask 1048512   ;;  %vm15_vm2 = vcmask 982912   ;;  %vm21_vm3 = vcmask 917312   ;;  %s207_s0 = inlined_call_operand.vmem [shape: f32[16,8], index: 0, kind: input, shape index: {}]   ;;  %s208_s1 = inlined_call_operand.vmem [shape: f32[1,128], index: 1, kind: output, shape index: {}]  }
   0x1   :  { %v101_v0 = vld [vmem:[%s207_s0 + $0xf] sm:$0x1]   ;;  %v103_v1 = vld [vmem:[%s207_s0 + $0xd] sm:$0x1]   ;;  %v105_v2 = vld [vmem:[%s207_s0 + $0xb] sm:$0x1]  }
   0x2   :  { %7 = vrot.lane.b32.xlu0 %v101_v0, %s131_s10  ;;  %19 = vrot.lane.b32.xlu1 %v103_v1, %s132_s11  ;;  %s133_s14 = smov 88   ;;  %v102_v3 = vld [vmem:[%s207_s0 + $0xe] sm:$0x1]   ;;  %v104_v4 = vld [vmem:[%s207_s0 + $0xc] sm:$0x1]   ;;  %s134_s19 = smov 112  }
   0x3   :  { %31 = vrot.lane.b32.xlu2 %v105_v2, %s133_s14  ;;  %s135_s20 = smov 96   ;;  %v106_v5 = vld [vmem:[%s207_s0 + $0xa] sm:$0x1]   ;;  %s136_s23 = smov 80   ;;  %v107_v6 = vld [vmem:[%s207_s0 + $0x9] sm:$0x1]  }
   0x4   :  { %v108_v7 = vld [vmem:[%s207_s0 + $0x8] sm:$0x1]   ;;  %s137_s28 = smov 72   ;;  %s138_s29 = smov 64   ;;  %v109_v8 = vld [vmem:[%s207_s0 + $0x7] sm:$0x1]  }
   0x5   :  { %s139_s3 = smov 56   ;;  %v110_v9 = vld [vmem:[%s207_s0 + $0x6] sm:$0x1]   ;;  %v111_v10 = vld [vmem:[%s207_s0 + $0x5] sm:$0x1]   ;;  %s140_s8 = smov 48  }
   0x6   :  { %s141_s9 = smov 40   ;;  %v112_v11 = vld [vmem:[%s207_s0 + $0x4] sm:$0x1]   ;;  %s142_s12 = smov 32   ;;  %v113_v12 = vld [vmem:[%s207_s0 + $0x3] sm:$0x1]  }
   0x7   :  { %v114_v13 = vld [vmem:[%s207_s0 + $0x2] sm:$0x1]   ;;  %s143_s17 = smov 24   ;;  %s144_s18 = smov 16   ;;  %v115_v14 = vld [vmem:[%s207_s0 + $0x1] sm:$0x1]  }
   0x8   :  { %s145_s21 = smov 8   ;;  %v2_v15 = vld [vmem:[%s207_s0] sm:$0x1]   ;;  %vm27_vm4 = vcmask 851712   ;;  %vm33_vm5 = vcmask 786112   ;;  %vm39_vm6 = vcmask 720512  }
   0x9   :  { %4 = vst.msk [vmem:[#allocation0] sm:$0x1] %vm3_vm0, %v2_v15   ;;  %vm45_vm7 = vcmask 654912   ;;  %vm51_vm8 = vcmask 589312   ;;  %vm57_vm9 = vcmask 523712   ;;  %vm63_vm10 = vcmask 458112  }
   0xa   :  { %13 = vrot.lane.b32.xlu0 %v102_v3, %s134_s19  ;;  %25 = vrot.lane.b32.xlu1 %v104_v4, %s135_s20  ;;  %vm69_vm11 = vcmask 392512   ;;  %vm75_vm12 = vcmask 326912   ;;  %vm81_vm13 = vcmask 261312   ;;  %vm87_vm14 = vcmask 195712  }
   0xb   :  { %37 = vrot.lane.b32.xlu2 %v106_v5, %s136_s23  ;;  %vm93_vm15 = vcmask 130112  }
  0x12   :  { %43 = vrot.lane.b32.xlu0 %v107_v6, %s137_s28  ;;  %49 = vrot.lane.b32.xlu1 %v108_v7, %s138_s29 }
  0x13   :  { %55 = vrot.lane.b32.xlu2 %v109_v8, %s139_s3 }
  0x1a   :  { %61 = vrot.lane.b32.xlu0 %v110_v9, %s140_s8  ;;  %67 = vrot.lane.b32.xlu1 %v111_v10, %s141_s9 }
  0x1b   :  { %73 = vrot.lane.b32.xlu2 %v112_v11, %s142_s12 }
  0x22   :  { %79 = vrot.lane.b32.xlu0 %v113_v12, %s143_s17  ;;  %85 = vrot.lane.b32.xlu1 %v114_v13, %s144_s18 }
  0x23   :  { %91 = vrot.lane.b32.xlu2 %v115_v14, %s145_s21 }
  0x5d   :  { %v32_v16 = vpop.permute.xlu2 %31  }
  0x65   :  { %v38_v17 = vpop.permute.xlu2 %37  }
  0x6d   :  { %v56_v18 = vpop.permute.xlu2 %55  }
  0x74   :  { %v8_v19 = vpop.permute.xlu0 %7   ;;  %v20_v20 = vpop.permute.xlu1 %19  }
  0x75   :  { %10 = vst.msk [vmem:[#allocation0] sm:$0x1] %vm9_vm1, %v8_v19   ;;  %v74_v21 = vpop.permute.xlu2 %73  }
  0x7c   :  { %v14_v22 = vpop.permute.xlu0 %13   ;;  %v26_v23 = vpop.permute.xlu1 %25  }
  0x7d   :  { %16 = vst.msk [vmem:[#allocation0] sm:$0x1] %vm15_vm2, %v14_v22   ;;  %v92_v24 = vpop.permute.xlu2 %91  }
  0x7e   :  { %22 = vst.msk [vmem:[#allocation0] sm:$0x1] %vm21_vm3, %v20_v20  }
  0x7f   :  { %28 = vst.msk [vmem:[#allocation0] sm:$0x1] %vm27_vm4, %v26_v23  }
  0x80   :  { %34 = vst.msk [vmem:[#allocation0] sm:$0x1] %vm33_vm5, %v32_v16  }
  0x81   :  { %40 = vst.msk [vmem:[#allocation0] sm:$0x1] %vm39_vm6, %v38_v17  }
  0x84   :  { %v44_v25 = vpop.permute.xlu0 %43   ;;  %v50_v26 = vpop.permute.xlu1 %49  }
  0x85   :  { %46 = vst.msk [vmem:[#allocation0] sm:$0x1] %vm45_vm7, %v44_v25  }
  0x86   :  { %52 = vst.msk [vmem:[#allocation0] sm:$0x1] %vm51_vm8, %v50_v26  }
  0x87   :  { %58 = vst.msk [vmem:[#allocation0] sm:$0x1] %vm57_vm9, %v56_v18  }
  0x8c   :  { %v62_v27 = vpop.permute.xlu0 %61   ;;  %v68_v28 = vpop.permute.xlu1 %67  }
  0x8d   :  { %64 = vst.msk [vmem:[#allocation0] sm:$0x1] %vm63_vm10, %v62_v27  }
  0x8e   :  { %70 = vst.msk [vmem:[#allocation0] sm:$0x1] %vm69_vm11, %v68_v28  }
  0x8f   :  { %76 = vst.msk [vmem:[#allocation0] sm:$0x1] %vm75_vm12, %v74_v21  }
  0x94   :  { %v80_v29 = vpop.permute.xlu0 %79   ;;  %v86_v30 = vpop.permute.xlu1 %85  }
  0x95   :  { %82 = vst.msk [vmem:[#allocation0] sm:$0x1] %vm81_vm13, %v80_v29  }
  0x96   :  { %88 = vst.msk [vmem:[#allocation0] sm:$0x1] %vm87_vm14, %v86_v30  }
  0x97   :  { %94 = vst.msk [vmem:[#allocation0] sm:$0x1] %vm93_vm15, %v92_v24  }
  0x9e   :  { %v97_v31 = vld [vmem:[#allocation0] sm:$0x1] }
  0x9f   :  { %100 = vst [vmem:[%s208_s1] sm:$0x1] %v97_v31 }

// kernel: logistic_regression_forward.1
= control target key start
LH: loop header
LB: loop body
LE: loop exit
PB: predicated region body
PF: predicated region fallthrough
CT: control target
= control target key end

     0   :  { %s816_s12 = smov 0   ;;  %s818_s13 = smov 0   ;;  %s1109_s0 = inlined_call_operand.vmem [shape: f32[18,512], index: 0, kind: input, shape index: {}]   ;;  %s1110_s1 = inlined_call_operand.vmem [shape: f32[512,128], index: 1, kind: input, shape index: {}]   ;;  %s1111_s2 = inlined_call_operand.vmem [shape: f32[1,128], index: 2, kind: input, shape index: {}]   ;;  %s1112_s3 = inlined_call_operand.vmem [shape: f32[18,128], index: 3, kind: output, shape index: {}]  }
   0x1   :  { %s820_s14 = smov 0  }
   0x2 LB: > { %s829_s15 = sadd.s32 4294967295, %s762_s14   ;;  %s831_s16 = sadd.s32 1, %s762_s14   ;;  %s762_s14 = sphi %s820_s14, %s1116_s14   ;;  %s758_s13 = sphi %s818_s13, %s1115_s13   ;;  %s754_s12 = sphi %s816_s12, %s1114_s12  }
   0x3   : > { %s85_s17 = ssub.s32 %s762_s14, %s831_s16  ;;  %s88_s18 = sadd.s32 1, %s758_s13 }
   0x4   : > { %p86_p0 = scmp.eq.s32.totalorder %s85_s17, 0  ;;  %p98_p1 = scmp.ne.s32.totalorder %s758_s13, %s754_s12 }
   0x5   : > { %p99_p2 = scmp.eq.s32.totalorder %s829_s15, 1  ;;  %p593_p3 = scmp.ge.s32.totalorder %s762_s14, 1 }
   0x6   : > { %s839_s19 = scalar_select %p86_p0, %s758_s13, %s88_s18  }
   0x7   : > { %p841_p4 = por %p99_p2, %p98_p1  ;;  %p149_p5 = scmp.lt.s32.totalorder %s762_s14, 3 }
   0x9   : > { %p150_p6 = pnand %p593_p3, %p149_p5 }
   0xa   : > { %s936_s14 = sshll.u32 (!%p150_p6), %s829_s15, 1  ;;  %s175_s7 = sand.u32 (!%p150_p6), 1, %s754_s12  }
   0xb   : > { %153 = sbr.rel (%p150_p6) target bundleno = 233 (0xe9), region = 32  ;;  %p184_p7 = scmp.lt.s32.totalorder (!%p150_p6), %s936_s14, 2 }
   0xc   : > { %s594_s8 = sshll.u32 (!%p150_p6), %s175_s7, 4 }
   0xd   : > { %s1064_s9 = scalar_lea.vmem (!%p150_p6), [#allocation2], %s594_s8  }
  0x10   : > { %v255_v0 = vld [vmem:[%s1110_s1 + $0x178] sm:$0xff]  ;;  %v254_v2 = vld [vmem:[%s1110_s1 + $0x170] sm:$0xff]  ;;  %v253_v6 = vld [vmem:[%s1110_s1 + $0x168] sm:$0xff]  ;;  %s984_s27 = scalar_select %p184_p7, %s936_s14, 2 }
  0x11   : > { %v223_v1 = vld [vmem:[%s1110_s1 + $0x78] sm:$0xff]  ;;  %322 = vmatpush.msra.mxu2 %v255_v0  ;;  %v222_v4 = vld [vmem:[%s1110_s1 + $0x70] sm:$0xff]  ;;  %v221_v8 = vld [vmem:[%s1110_s1 + $0x68] sm:$0xff]  ;;  %s378_s12 = ssub.s32 (%p841_p4), 3, %s936_s14  ;;  %s616_s10 = sshll.u32 (%p841_p4), %s829_s15, 4 }
  0x12   : > { %276 = vmatpush.msra.mxu0 %v223_v1  ;;  %v271_v3 = vld [vmem:[%s1110_s1 + $0x1f8] sm:$0xff]  ;;  %v270_v7 = vld [vmem:[%s1110_s1 + $0x1f0] sm:$0xff]  ;;  %v269_v10 = vld [vmem:[%s1110_s1 + $0x1e8] sm:$0xff]  ;;  %s615_s24 = sshll.u32 %s984_s27, 5  ;;  %p379_p8 = scmp.lt.s32.totalorder (%p841_p4), %s378_s12, 2 }
  0x13   : > { %v239_v5 = vld [vmem:[%s1110_s1 + $0xf8] sm:$0xff]  ;;  %345 = vmatpush.msra.mxu3 %v271_v3  ;;  %323 = vmatpush.msra.mxu2 %v254_v2  ;;  %v238_v9 = vld [vmem:[%s1110_s1 + $0xf0] sm:$0xff]  ;;  %v252_v11 = vld [vmem:[%s1110_s1 + $0x160] sm:$0xff]  ;;  %s1032_s17 = scalar_lea.vmem %s1109_s0, %s615_s24  ;;  %s1075_s18 = scalar_lea.vmem (%p841_p4), %s1112_s3, %s616_s10  }
  0x14   : > { %299 = vmatpush.msra.mxu1 %v239_v5  ;;  %277 = vmatpush.msra.mxu0 %v222_v4  ;;  %v220_v12 = vld [vmem:[%s1110_s1 + $0x60] sm:$0xff]  ;;  %v237_v13 = vld [vmem:[%s1110_s1 + $0xe8] sm:$0xff]  ;;  %v251_v16 = vld [vmem:[%s1110_s1 + $0x158] sm:$0xff] }
  0x15   : > { %346 = vmatpush.msra.mxu3 %v270_v7  ;;  %324 = vmatpush.msra.mxu2 %v253_v6  ;;  %v268_v14 = vld [vmem:[%s1110_s1 + $0x1e0] sm:$0xff]  ;;  %v219_v17 = vld [vmem:[%s1110_s1 + $0x58] sm:$0xff]  ;;  %v250_v20 = vld [vmem:[%s1110_s1 + $0x150] sm:$0xff] }
  0x16   : > { %300 = vmatpush.msra.mxu1 %v238_v9  ;;  %278 = vmatpush.msra.mxu0 %v221_v8  ;;  %v236_v15 = vld [vmem:[%s1110_s1 + $0xe0] sm:$0xff]  ;;  %v267_v18 = vld [vmem:[%s1110_s1 + $0x1d8] sm:$0xff]  ;;  %v218_v21 = vld [vmem:[%s1110_s1 + $0x50] sm:$0xff] }
  0x17   : > { %347 = vmatpush.msra.mxu3 %v269_v10  ;;  %325 = vmatpush.msra.mxu2 %v252_v11  ;;  %v235_v19 = vld [vmem:[%s1110_s1 + $0xd8] sm:$0xff]  ;;  %v266_v22 = vld [vmem:[%s1110_s1 + $0x1d0] sm:$0xff]  ;;  %v249_v24 = vld [vmem:[%s1110_s1 + $0x148] sm:$0xff] }
  0x18   : > { %301 = vmatpush.msra.mxu1 %v237_v13  ;;  %279 = vmatpush.msra.mxu0 %v220_v12  ;;  %v234_v23 = vld [vmem:[%s1110_s1 + $0xd0] sm:$0xff]  ;;  %v217_v25 = vld [vmem:[%s1110_s1 + $0x48] sm:$0xff]  ;;  %v248_v28 = vld [vmem:[%s1110_s1 + $0x140] sm:$0xff] }
  0x19   : > { %348 = vmatpush.msra.mxu3 %v268_v14  ;;  %326 = vmatpush.msra.mxu2 %v251_v16  ;;  %v265_v26 = vld [vmem:[%s1110_s1 + $0x1c8] sm:$0xff]  ;;  %v216_v29 = vld [vmem:[%s1110_s1 + $0x40] sm:$0xff]  ;;  %v247_v32 = vld [vmem:[%s1110_s1 + $0x138] sm:$0xff] }
  0x1a   : > { %302 = vmatpush.msra.mxu1 %v236_v15  ;;  %280 = vmatpush.msra.mxu0 %v219_v17  ;;  %v233_v27 = vld [vmem:[%s1110_s1 + $0xc8] sm:$0xff]  ;;  %v264_v30 = vld [vmem:[%s1110_s1 + $0x1c0] sm:$0xff]  ;;  %v215_v33 = vld [vmem:[%s1110_s1 + $0x38] sm:$0xff] }
  0x1b   : > { %349 = vmatpush.msra.mxu3 %v267_v18  ;;  %327 = vmatpush.msra.mxu2 %v250_v20  ;;  %v232_v31 = vld [vmem:[%s1110_s1 + $0xc0] sm:$0xff]  ;;  %v263_v34 = vld [vmem:[%s1110_s1 + $0x1b8] sm:$0xff]  ;;  %v246_v36 = vld [vmem:[%s1110_s1 + $0x130] sm:$0xff] }
  0x1c   : > { %303 = vmatpush.msra.mxu1 %v235_v19  ;;  %281 = vmatpush.msra.mxu0 %v218_v21  ;;  %v231_v35 = vld [vmem:[%s1110_s1 + $0xb8] sm:$0xff]  ;;  %v214_v37 = vld [vmem:[%s1110_s1 + $0x30] sm:$0xff]  ;;  %v245_v40 = vld [vmem:[%s1110_s1 + $0x128] sm:$0xff] }
  0x1d   : > { %350 = vmatpush.msra.mxu3 %v266_v22  ;;  %328 = vmatpush.msra.mxu2 %v249_v24  ;;  %v262_v38 = vld [vmem:[%s1110_s1 + $0x1b0] sm:$0xff]  ;;  %v213_v41 = vld [vmem:[%s1110_s1 + $0x28] sm:$0xff]  ;;  %v244_v44 = vld [vmem:[%s1110_s1 + $0x120] sm:$0xff] }
  0x1e   : > { %304 = vmatpush.msra.mxu1 %v234_v23  ;;  %282 = vmatpush.msra.mxu0 %v217_v25  ;;  %v230_v39 = vld [vmem:[%s1110_s1 + $0xb0] sm:$0xff]  ;;  %v261_v42 = vld [vmem:[%s1110_s1 + $0x1a8] sm:$0xff]  ;;  %v212_v45 = vld [vmem:[%s1110_s1 + $0x20] sm:$0xff] }
  0x1f   : > { %351 = vmatpush.msra.mxu3 %v265_v26  ;;  %329 = vmatpush.msra.mxu2 %v248_v28  ;;  %v229_v43 = vld [vmem:[%s1110_s1 + $0xa8] sm:$0xff]  ;;  %v260_v46 = vld [vmem:[%s1110_s1 + $0x1a0] sm:$0xff]  ;;  %v243_v48 = vld [vmem:[%s1110_s1 + $0x118] sm:$0xff] }
  0x20   : > { %305 = vmatpush.msra.mxu1 %v233_v27  ;;  %283 = vmatpush.msra.mxu0 %v216_v29  ;;  %v228_v47 = vld [vmem:[%s1110_s1 + $0xa0] sm:$0xff]  ;;  %v211_v49 = vld [vmem:[%s1110_s1 + $0x18] sm:$0xff]  ;;  %v242_v52 = vld [vmem:[%s1110_s1 + $0x110] sm:$0xff] }
  0x21   : > { %352 = vmatpush.msra.mxu3 %v264_v30  ;;  %330 = vmatpush.msra.mxu2 %v247_v32  ;;  %v259_v50 = vld [vmem:[%s1110_s1 + $0x198] sm:$0xff]  ;;  %v210_v53 = vld [vmem:[%s1110_s1 + $0x10] sm:$0xff]  ;;  %v241_v56 = vld [vmem:[%s1110_s1 + $0x108] sm:$0xff] }
  0x22   : > { %306 = vmatpush.msra.mxu1 %v232_v31  ;;  %284 = vmatpush.msra.mxu0 %v215_v33  ;;  %v227_v51 = vld [vmem:[%s1110_s1 + $0x98] sm:$0xff]  ;;  %v258_v54 = vld [vmem:[%s1110_s1 + $0x190] sm:$0xff]  ;;  %v209_v57 = vld [vmem:[%s1110_s1 + $0x8] sm:$0xff] }
  0x23   : > { %353 = vmatpush.msra.mxu3 %v263_v34  ;;  %331 = vmatpush.msra.mxu2 %v246_v36  ;;  %v226_v55 = vld [vmem:[%s1110_s1 + $0x90] sm:$0xff]  ;;  %v257_v58 = vld [vmem:[%s1110_s1 + $0x188] sm:$0xff]  ;;  %v240_v60 = vld [vmem:[%s1110_s1 + $0x100] sm:$0xff] }
  0x24   : > { %307 = vmatpush.msra.mxu1 %v231_v35  ;;  %285 = vmatpush.msra.mxu0 %v214_v37  ;;  %v225_v59 = vld [vmem:[%s1110_s1 + $0x88] sm:$0xff]  ;;  %v208_v61 = vld [vmem:[%s1110_s1] sm:$0xff]  ;;  %v202_v62 = vld [vmem:[%s1032_s17 + $0x10] sm:$0xff] }
  0x25   : > { %354 = vmatpush.msra.mxu3 %v262_v38  ;;  %332 = vmatpush.msra.mxu2 %v245_v40  ;;  %v256_v63 = vld [vmem:[%s1110_s1 + $0x180] sm:$0xff]  ;;  %v203_v1 = vld [vmem:[%s1032_s17 + $0x18] sm:$0xff]  ;;  %v201_v3 = vld [vmem:[%s1032_s17 + $0x8] sm:$0xff] }
  0x26   : > { %308 = vmatpush.msra.mxu1 %v230_v39  ;;  %286 = vmatpush.msra.mxu0 %v213_v41  ;;  %v200_v0 = vld [vmem:[%s1032_s17] sm:$0xff]  ;;  %v206_v4 = vld [vmem:[%s1032_s17 + $0x30] sm:$0xff]  ;;  %v207_v6 = vld [vmem:[%s1032_s17 + $0x38] sm:$0xff] }
  0x27   : > { %355 = vmatpush.msra.mxu3 %v261_v42  ;;  %333 = vmatpush.msra.mxu2 %v244_v44  ;;  %v224_v2 = vld [vmem:[%s1110_s1 + $0x80] sm:$0xff]  ;;  %v205_v7 = vld [vmem:[%s1032_s17 + $0x28] sm:$0xff] }
  0x28   : > { %309 = vmatpush.msra.mxu1 %v229_v43  ;;  %287 = vmatpush.msra.mxu0 %v212_v45  ;;  %v204_v5 = vld [vmem:[%s1032_s17 + $0x20] sm:$0xff] }
  0x29   : > { %356 = vmatpush.msra.mxu3 %v260_v46  ;;  %334 = vmatpush.msra.mxu2 %v243_v48  ;;  %v707_v8 = vld [vmem:[%s1111_s2] ss:$0 sm:$0xff] }
  0x2a   : > { %310 = vmatpush.msra.mxu1 %v228_v47  ;;  %288 = vmatpush.msra.mxu0 %v211_v49 }
  0x2b   : > { %357 = vmatpush.msra.mxu3 %v259_v50  ;;  %335 = vmatpush.msra.mxu2 %v242_v52 }
  0x2c   : > { %311 = vmatpush.msra.mxu1 %v227_v51  ;;  %289 = vmatpush.msra.mxu0 %v210_v53 }
  0x2d   : > { %358 = vmatpush.msra.mxu3 %v258_v54  ;;  %336 = vmatpush.msra.mxu2 %v241_v56 }
  0x2e   : > { %312 = vmatpush.msra.mxu1 %v226_v55  ;;  %290 = vmatpush.msra.mxu0 %v209_v57 }
  0x2f   : > { %359 = vmatpush.msra.mxu3 %v257_v58  ;;  %337 = vmatpush.msra.mxu2 %v240_v60 }
  0x30   : > { %313 = vmatpush.msra.mxu1 %v225_v59  ;;  %291 = vmatpush.msra.mxu0 %v208_v61 }
  0x31   : > { %338 = vmatmul.f32.vlgmr.msra.gmra.mxu2 %v202_v62  ;;  %360 = vmatpush.msra.mxu3 %v256_v63 }
  0x32   : > { %292 = vmatmul.f32.vlgmr.msra.gmra.mxu0 %v200_v0  ;;  %361 = vmatmul.f32.vlgmr.msra.gmra.mxu3 %v203_v1 }
  0x33   : > { %314 = vmatpush.msra.mxu1 %v224_v2 }
  0x34   : > { %315 = vmatmul.f32.vlgmr.msra.gmra.mxu1 %v201_v3 }
  0x39   : > { %341 = vmatmul.f32.gmra.mxu2 %v206_v4 }
  0x3a   : > { %295 = vmatmul.f32.gmra.mxu0 %v204_v5  ;;  %364 = vmatmul.f32.gmra.mxu3 %v207_v6 }
  0x3c   : > { %318 = vmatmul.f32.gmra.mxu1 %v205_v7 }
  0xaf   : > { %v293_v9 = vpop.f32.mrf.mxu0 }
  0xb0   : > { %v294_v10 = vadd.f32 %v707_v8, %v293_v9 }
  0xb1   : > { %v316_v11 = vpop.f32.mrf.mxu1 }
  0xb2   : > { %v317_v12 = vadd.f32 %v316_v11, %v294_v10 }
  0xb4   : > { %v339_v13 = vpop.f32.mrf.mxu2 }
  0xb5   : > { %v340_v14 = vadd.f32 %v339_v13, %v317_v12  ;;  %v362_v15 = vpop.f32.mrf.mxu3 }
  0xb7   : > { %v363_v16 = vadd.f32 %v362_v15, %v340_v14  ;;  %v296_v17 = vpop.f32.mrf.mxu0 }
  0xb8   : > { %v297_v18 = vadd.f32 %v707_v8, %v296_v17 }
  0xb9   : > { %368 = vst [vmem:[%s1064_s9] sm:$0xff] %v363_v16  ;;  %v319_v19 = vpop.f32.mrf.mxu1 }
  0xba   : > { %v320_v20 = vadd.f32 %v319_v19, %v297_v18 }
  0xbc   : > { %v342_v21 = vpop.f32.mrf.mxu2 }
  0xbd   : > { %v343_v22 = vadd.f32 %v342_v21, %v320_v20  ;;  %v365_v23 = vpop.f32.mrf.mxu3  ;;  %376 = sbr.rel (!%p841_p4) target bundleno = 233 (0xe9), region = 36 }
  0xbf   : > { %v366_v24 = vadd.f32 %v365_v23, %v343_v22 }
  0xc1   : > { %369 = vst [vmem:[%s1064_s9 + $0x8] sm:$0xff] %v366_v24 }
  0xc2   : > { %s1118_s12 = smov (!%p379_p8, %s378_s12), 2 }
  0xc3   : > { %s600_s21 = sshll.u32 %s1118_s12, 3 }
  0xc4   : > { %p603_p9 = scmp.eq.s32.totalorder %s600_s21, 0 }
  0xc5   : > { %s1081_s22 = sshrl.u32 (!%p603_p9), %s1118_s12, 1 }
  0xc6   : > { %387 = sbr.rel (%p603_p9) target bundleno = 233 (0xe9), region = 40  ;;  %p604_p10 = scmp.le.s32.totalorder (!%p603_p9), %s1081_s22, 0 }
  0xcb   : > { %546 = sbr.rel (%p604_p10) target bundleno = 216 (0xd8), region = 116  ;;  %s764_s15 = smov (!%p604_p10), %s1075_s18  }
  0xcc   : > { %s768_s20 = smov (!%p604_p10), %s1064_s9   ;;  %s772_s14 = smov (!%p604_p10), 0  }
  0xcd   : > { %s776_s23 = smov (!%p604_p10), 0  }
  0xd0 LB: >> { %v452_v25 = vld [vmem:[%s770_s20] sm:$0xff]  ;;  %v454_v26 = vld [vmem:[%s770_s20 + $0x8] sm:$0xff]  ;;  %s456_s25 = sadd.s32 1, %s774_s14  ;;  %s446_s23 = sadd.s32 1, %s778_s23   ;;  %s778_s23 = sphi %s776_s23, %s446_s23   ;;  %s774_s14 = sphi %s772_s14, %s773_s14   ;;  %s770_s20 = sphi %s768_s20, %s461_s20   ;;  %s766_s15 = sphi %s764_s15, %s462_s15  }
  0xd1   : >> { %453 = vst [vmem:[%s766_s15] sm:$0xff] %v452_v25  ;;  %p457_p11 = scmp.ge.s32.totalorder %s456_s25, %s1081_s22  ;;  %p445_p12 = scmp.ge.s32.totalorder %s446_s23, %s1081_s22 }
  0xd2   : >> { %455 = vst [vmem:[%s766_s15 + $0x8] sm:$0xff] %v454_v26 }
  0xd3   : >> { %s1120_s25 = smov (%p457_p11, %s456_s25), 0  ;;  %448 = sbr.rel (!%p445_p12) target bundleno = 208 (0xd0), region = 122 }
  0xd4   : >> { %s605_s26 = sshll.u32 %s1120_s25, 4  ;;  %s773_s14 = smov %s1120_s25  }
  0xd5   : >> { %s461_s20 = scalar_lea.vmem %s1064_s9, %s605_s26 [#allocation2]   ;;  %s462_s15 = scalar_lea.vmem %s1075_s18, %s605_s26  }
  0xd8 PF: > { %s1091_s24 = sand.u32 1, %s1118_s12   ;;  %s617_s28 = sshll.u32 %s1081_s22, 4 }
  0xd9   : > { %s467_s29 = scalar_lea.vmem %s1064_s9, %s617_s28 [#allocation2]   ;;  %s469_s30 = scalar_lea.vmem %s1075_s18, %s617_s28  }
  0xda   : > { %p610_p13 = scmp.le.s32.totalorder %s1091_s24, 0 }
  0xdb   : > { %s780_s4 = smov (!%p610_p13), %s469_s30   ;;  %s784_s5 = smov (!%p610_p13), %s467_s29  }
  0xdc   : > { %560 = sbr.rel (%p610_p13) target bundleno = 233 (0xe9), region = 127  ;;  %s788_s6 = smov (!%p610_p13), 0  }
  0xdd   : > { %s792_s27 = smov (!%p610_p13), 0  }
  0xe1 LB: >> { %v479_v27 = vld [vmem:[%s786_s5] sm:$0xff]  ;;  %s481_s7 = sadd.s32 1, %s790_s6  ;;  %s473_s27 = sadd.s32 1, %s794_s27   ;;  %s794_s27 = sphi %s792_s27, %s473_s27   ;;  %s790_s6 = sphi %s788_s6, %s789_s6   ;;  %s786_s5 = sphi %s784_s5, %s486_s5   ;;  %s782_s4 = sphi %s780_s4, %s487_s4  }
  0xe2   : >> { %480 = vst [vmem:[%s782_s4] sm:$0xff] %v479_v27  ;;  %p482_p0 = scmp.ge.s32.totalorder %s481_s7, %s1091_s24  ;;  %p472_p1 = scmp.ge.s32.totalorder %s473_s27, %s1091_s24 }
  0xe4   : >> { %s1122_s7 = smov (%p482_p0, %s481_s7), 0  ;;  %475 = sbr.rel (!%p472_p1) target bundleno = 225 (0xe1), region = 133 }
  0xe5   : >> { %s611_s8 = sshll.u32 %s1122_s7, 3  ;;  %s789_s6 = smov %s1122_s7  }
  0xe6   : >> { %s486_s5 = scalar_lea.vmem %s467_s29, %s611_s8 [#allocation2]   ;;  %s487_s4 = scalar_lea.vmem %s469_s30, %s611_s8  }
  0xe9 PF: > { %p10_p2 = scmp.ge.s32.totalorder %s831_s16, 4   ;;  %s1114_s12 = smov %s758_s13 }
  0xea   : > { %s1115_s13 = smov %s839_s19  ;;  %s1116_s14 = smov %s831_s16 }
  0xeb   :  { %12 = sbr.rel (!%p10_p2) target bundleno = 2 (0x2), region = 144 }

</bundles_post_ra>
